<compile_context>
chip_gen: v6e
topology: v6e:2x2x1
jax: 0.10.0
libtpu: 0.0.40
codegen_flags: <defaults>
</compile_context>

<pallas_src>
import functools

import jax
import jax.numpy as jnp
from jax.experimental import pallas as pl
from jax.experimental.pallas import tpu as pltpu


def _round_up(x, m):
    return ((x + m - 1) // m) * m


# ----------------------------------------------------------------------------
# Pass 1 (use_bn=True): K-tiled matmul + per-(row-tile, kout-tile) partial
# batch statistics.  Grid = (kout_tiles, row_tiles, k_tiles), k innermost
# ("arbitrary"), f32 accumulator in VMEM scratch.  No bias here: a per-column
# constant cancels exactly in (y - mean) and is folded into the BN shift.
# ----------------------------------------------------------------------------
def _linear_stats_kernel(x_ref, wt_ref, y_ref, stats_ref, acc_ref, *,
                         compute_dtype):
    k = pl.program_id(2)

    @pl.when(k == 0)
    def _():
        acc_ref[...] = jnp.zeros_like(acc_ref)

    acc_ref[...] += jnp.dot(x_ref[...].astype(compute_dtype), wt_ref[...],
                            preferred_element_type=jnp.float32)

    @pl.when(k == pl.num_programs(2) - 1)
    def _():
        y = acc_ref[...]                              # f32 accumulator
        y_ref[...] = y.astype(y_ref.dtype)            # bf16 activation slab
        stats_ref[:, 0:1, :] = jnp.sum(y, axis=0, keepdims=True)[None]
        stats_ref[:, 1:2, :] = jnp.sum(y * y, axis=0, keepdims=True)[None]


# ----------------------------------------------------------------------------
# Pass 1 (use_bn=False): fully fused single pass — no stats, no second HBM
# round trip.  Bias + ReLU (+ residual) applied on the f32 accumulator.
# ----------------------------------------------------------------------------
def _linear_bias_relu_kernel(x_ref, wt_ref, b_ref, o_ref, acc_ref, *,
                             compute_dtype):
    k = pl.program_id(2)

    @pl.when(k == 0)
    def _():
        acc_ref[...] = jnp.zeros_like(acc_ref)

    acc_ref[...] += jnp.dot(x_ref[...].astype(compute_dtype), wt_ref[...],
                            preferred_element_type=jnp.float32)

    @pl.when(k == pl.num_programs(2) - 1)
    def _():
        o_ref[...] = jnp.maximum(acc_ref[...] + b_ref[...], 0.0).astype(o_ref.dtype)


def _linear_bias_relu_res_kernel(x_ref, wt_ref, b_ref, xres_ref, o_ref, acc_ref,
                                 *, compute_dtype):
    k = pl.program_id(2)

    @pl.when(k == 0)
    def _():
        acc_ref[...] = jnp.zeros_like(acc_ref)

    acc_ref[...] += jnp.dot(x_ref[...].astype(compute_dtype), wt_ref[...],
                            preferred_element_type=jnp.float32)

    @pl.when(k == pl.num_programs(2) - 1)
    def _():
        out = jnp.maximum(acc_ref[...] + b_ref[...], 0.0)
        out = out + xres_ref[...].astype(jnp.float32)
        o_ref[...] = out.astype(o_ref.dtype)


# ----------------------------------------------------------------------------
# Pass 2: folded batch-norm (precomputed scale/shift) + ReLU (+ residual).
# Pure bandwidth -> larger, lane-dense blocks of its own.
# ----------------------------------------------------------------------------
def _bn_relu_kernel(y_ref, scale_ref, shift_ref, o_ref):
    y = y_ref[...].astype(jnp.float32)
    o_ref[...] = jnp.maximum(y * scale_ref[...] + shift_ref[...], 0.0
                             ).astype(o_ref.dtype)


def _bn_relu_res_kernel(y_ref, scale_ref, shift_ref, x_ref, o_ref):
    y = y_ref[...].astype(jnp.float32)
    out = jnp.maximum(y * scale_ref[...] + shift_ref[...], 0.0)
    o_ref[...] = (out + x_ref[...].astype(jnp.float32)).astype(o_ref.dtype)


# ----------------------------------------------------------------------------
# Wrapper (glue: reshape, padding, grid / BlockSpec setup, BN fold).
# ----------------------------------------------------------------------------
def fc_layer_forward(inputs, W, b, gamma=None, beta=None, *, use_bn=True,
                     eps=1e-5, compute_dtype=jnp.bfloat16,
                     y_dtype=jnp.bfloat16):
    lead_shape = inputs.shape[:-1]
    k_in = inputs.shape[-1]
    k_out = W.shape[0]
    residual = (k_in == k_out)
    out_dtype = inputs.dtype

    x = inputs.reshape(-1, k_in)
    N = x.shape[0]

    # ---- tiled geometry -----------------------------------------------------
    LANE = 128
    SUB = 16 if jnp.dtype(compute_dtype) == jnp.dtype(jnp.bfloat16) else 8

    tk = min(_round_up(k_in, LANE), 2048)          # contraction tile (lanes)
    kin_p = _round_up(k_in, tk)
    grid_k = kin_p // tk

    tko = min(_round_up(k_out, LANE), 512)         # kout tile (lane-dense)
    kout_p = _round_up(k_out, tko)
    grid_ko = kout_p // tko

    tn = min(256, _round_up(N, SUB))               # row tile (sublanes)
    n_p = _round_up(N, tn)
    grid_rows = n_p // tn

    vmem_limit = 48 * 1024 * 1024                  # under v7x's 64 MiB physical
    cparams3 = pltpu.CompilerParams(
        dimension_semantics=("parallel", "parallel", "arbitrary"),
        vmem_limit_bytes=vmem_limit)
    cparams2 = pltpu.CompilerParams(
        dimension_semantics=("parallel", "parallel"),
        vmem_limit_bytes=vmem_limit)

    # ---- operand prep -------------------------------------------------------
    # x: feed as-is (per-tile in-kernel cast) unless padding is required.
    if N == n_p and k_in == kin_p:
        x_mxu = x
    else:
        x_mxu = jnp.pad(x.astype(compute_dtype),
                        ((0, n_p - N), (0, kin_p - k_in)))
    # W transposed / cast once in the wrapper (never per grid step).
    w_t = W.astype(compute_dtype).T
    if w_t.shape != (kin_p, kout_p):
        w_t = jnp.pad(w_t, ((0, kin_p - k_in), (0, kout_p - k_out)))

    if residual:
        x_res = x
        if x_res.shape != (n_p, kout_p):
            x_res = jnp.pad(x_res, ((0, n_p - N), (0, kout_p - k_in)))

    # Grid order: kout-tile outer, row-tile middle, k-tile inner, so the W^T
    # block index is constant over the inner row loop (W fetched once per kout
    # tile) and the accumulator reduction runs over the innermost axis.
    grid = (grid_ko, grid_rows, grid_k)
    x_spec = pl.BlockSpec((tn, tk), lambda j, i, k: (i, k))
    wt_spec = pl.BlockSpec((tk, tko), lambda j, i, k: (k, j))
    acc_scratch = pltpu.VMEM((tn, tko), jnp.float32)

    if not use_bn:
        # ---- fused single pass: linear + bias + relu (+ residual) -----------
        b_p = jnp.pad(b.astype(jnp.float32), (0, kout_p - k_out)).reshape(1, kout_p)
        b_spec = pl.BlockSpec((1, tko), lambda j, i, k: (0, j))
        if residual:
            kern = functools.partial(_linear_bias_relu_res_kernel,
                                     compute_dtype=compute_dtype)
            in_specs = [x_spec, wt_spec, b_spec,
                        pl.BlockSpec((tn, tko), lambda j, i, k: (i, j))]
            args = (x_mxu, w_t, b_p, x_res)
        else:
            kern = functools.partial(_linear_bias_relu_kernel,
                                     compute_dtype=compute_dtype)
            in_specs = [x_spec, wt_spec, b_spec]
            args = (x_mxu, w_t, b_p)
        out_p = pl.pallas_call(
            kern,
            out_shape=jax.ShapeDtypeStruct((n_p, kout_p), out_dtype),
            grid=grid,
            in_specs=in_specs,
            out_specs=pl.BlockSpec((tn, tko), lambda j, i, k: (i, j)),
            scratch_shapes=[acc_scratch],
            compiler_params=cparams3,
        )(*args)
        return out_p[:N, :k_out].reshape(*lead_shape, k_out)

    # ---- pass 1: linear (bias-free) + per-tile partial stats ----------------
    kern1 = functools.partial(_linear_stats_kernel, compute_dtype=compute_dtype)
    y, part_stats = pl.pallas_call(
        kern1,
        out_shape=(
            jax.ShapeDtypeStruct((n_p, kout_p), y_dtype),
            jax.ShapeDtypeStruct((grid_rows, 2, kout_p), jnp.float32),
        ),
        grid=grid,
        in_specs=[x_spec, wt_spec],
        out_specs=(
            pl.BlockSpec((tn, tko), lambda j, i, k: (i, j)),
            pl.BlockSpec((1, 2, tko), lambda j, i, k: (i, 0, j)),
        ),
        scratch_shapes=[acc_scratch],
        compiler_params=cparams3,
    )(x_mxu, w_t)

    # ---- between passes: reduce partial stats, fold BN (and bias) ----------
    stats = jnp.sum(part_stats, axis=0)            # (2, kout_p), bias-free sums
    inv_n = 1.0 / float(N)
    mean = stats[0] * inv_n
    # shift-invariant variance; clamp guards f32 cancellation for tiny var.
    var = jnp.maximum(stats[1] * inv_n - mean * mean, 0.0)
    g_p = jnp.pad(gamma.astype(jnp.float32), (0, kout_p - k_out))
    be_p = jnp.pad(beta.astype(jnp.float32), (0, kout_p - k_out))
    scale = g_p * jax.lax.rsqrt(var + eps)
    shift = be_p - mean * scale                    # linear bias cancels exactly
    scale = scale.reshape(1, kout_p)
    shift = shift.reshape(1, kout_p)

    # ---- pass 2: y*scale + shift -> relu (-> + x); bigger lane-dense tiles --
    tn2 = 512 if (n_p % 512 == 0) else tn
    tko2 = kout_p if kout_p <= 2048 else tko
    grid2 = (n_p // tn2, kout_p // tko2)
    in_specs2 = [
        pl.BlockSpec((tn2, tko2), lambda i, j: (i, j)),   # y (bf16)
        pl.BlockSpec((1, tko2), lambda i, j: (0, j)),     # scale
        pl.BlockSpec((1, tko2), lambda i, j: (0, j)),     # shift
    ]
    if residual:
        in_specs2.append(pl.BlockSpec((tn2, tko2), lambda i, j: (i, j)))
        args2 = (y, scale, shift, x_res)
        kern2 = _bn_relu_res_kernel
    else:
        args2 = (y, scale, shift)
        kern2 = _bn_relu_kernel

    out_p = pl.pallas_call(
        kern2,
        out_shape=jax.ShapeDtypeStruct((n_p, kout_p), out_dtype),
        grid=grid2,
        in_specs=in_specs2,
        out_specs=pl.BlockSpec((tn2, tko2), lambda i, j: (i, j)),
        compiler_params=cparams2,
    )(*args2)

    return out_p[:N, :k_out].reshape(*lead_shape, k_out)


# ----------------------------------------------------------------------------
# Pure-JAX reference (mirrors the PyTorch forward in training mode; matmul is
# quantized to the same compute_dtype as the kernel; the BN activation slab is
# kept in f32, so the kernel's bf16 y storage needs a ~1e-2 tolerance).
# ----------------------------------------------------------------------------
def fc_layer_reference(inputs, W, b, gamma=None, beta=None, *, use_bn=True,
                       eps=1e-5, compute_dtype=jnp.bfloat16):
    lead_shape = inputs.shape[:-1]
    k_in = inputs.shape[-1]
    k_out = W.shape[0]
    x = inputs.reshape(-1, k_in)
    y = jnp.dot(x.astype(compute_dtype), W.T.astype(compute_dtype),
                preferred_element_type=jnp.float32) + b.astype(jnp.float32)
    if use_bn:
        mean = jnp.mean(y, axis=0, keepdims=True)
        var = jnp.mean(y * y, axis=0, keepdims=True) - mean * mean
        y = (y - mean) * jax.lax.rsqrt(var + eps) * gamma + beta
    y = jnp.maximum(y, 0.0)
    y = y.reshape(*lead_shape, k_out).astype(inputs.dtype)
    if k_in == k_out:
        y = y + inputs
    return y


if __name__ == "__main__":
    fwd = jax.jit(fc_layer_forward,
                  static_argnames=("use_bn", "eps", "compute_dtype", "y_dtype"))

    # ---- case 1: residual + BN (k_out == k_in) ------------------------------
    k_in, k_out = 32, 32
    lead = (2, 8)                                    # N = 16 flattened rows
    k_x, k_w, k_b = jax.random.split(jax.random.PRNGKey(0), 3)
    inputs = jax.random.normal(k_x, lead + (k_in,), dtype=jnp.float32)
    bound = 1.0 / jnp.sqrt(jnp.float32(k_in))
    W = jax.random.uniform(k_w, (k_out, k_in), jnp.float32, -bound, bound)
    b = jax.random.uniform(k_b, (k_out,), jnp.float32, -bound, bound)
    gamma = jnp.ones((k_out,), jnp.float32)          # BatchNorm1d default weight
    beta = jnp.zeros((k_out,), jnp.float32)          # BatchNorm1d default bias

    out = jax.block_until_ready(fwd(inputs, W, b, gamma, beta, use_bn=True))
    ref = fc_layer_reference(inputs, W, b, gamma, beta, use_bn=True)
    assert out.shape == lead + (k_out,)
    # bf16 storage of the BN input slab -> ~1e-2 level differences vs f32 ref.
    assert jnp.allclose(out, ref, rtol=2e-2, atol=2e-2), "mismatch (residual+BN)"

    # ---- case 2: no residual, BN, N not a multiple of the row tile ----------
    k_in2, k_out2 = 32, 48
    lead2 = (13,)                                    # N = 13 -> zero-padded rows
    k_x2, k_w2, k_b2 = jax.random.split(jax.random.PRNGKey(1), 3)
    inputs2 = jax.random.normal(k_x2, lead2 + (k_in2,), dtype=jnp.float32)
    bound2 = 1.0 / jnp.sqrt(jnp.float32(k_in2))
    W2 = jax.random.uniform(k_w2, (k_out2, k_in2), jnp.float32, -bound2, bound2)
    b2 = jax.random.uniform(k_b2, (k_out2,), jnp.float32, -bound2, bound2)
    gamma2 = jnp.ones((k_out2,), jnp.float32)
    beta2 = jnp.zeros((k_out2,), jnp.float32)

    out2 = jax.block_until_ready(fwd(inputs2, W2, b2, gamma2, beta2, use_bn=True))
    ref2 = fc_layer_reference(inputs2, W2, b2, gamma2, beta2, use_bn=True)
    assert out2.shape == lead2 + (k_out2,)
    assert jnp.allclose(out2, ref2, rtol=2e-2, atol=2e-2), "mismatch (padded rows)"

    # ---- case 3: use_bn=False fused single-pass path (+ residual) -----------
    out3 = jax.block_until_ready(fwd(inputs, W, b, use_bn=False))
    ref3 = fc_layer_reference(inputs, W, b, use_bn=False)
    assert out3.shape == lead + (k_out,)
    assert jnp.allclose(out3, ref3, rtol=2e-3, atol=2e-3), "mismatch (no-BN fused)"

    print("KERNEL_OK")
</pallas_src>

<mosaic_0001>
module attributes {stable_mosaic.version = 11 : i64} {
  func.func @_linear_stats_kernel(%arg0: i32, %arg1: i32, %arg2: i32, %arg3: memref<16x128xbf16, #tpu.memory_space<vmem>>, %arg4: memref<128x128xbf16, #tpu.memory_space<vmem>>, %arg5: memref<16x128xbf16, #tpu.memory_space<vmem>>, %arg6: memref<1x2x128xf32, #tpu.memory_space<vmem>>, %arg7: memref<16x128xf32, #tpu.memory_space<vmem>>) attributes {dimension_semantics = [#tpu.dimension_semantics<parallel>, #tpu.dimension_semantics<parallel>, #tpu.dimension_semantics<arbitrary>], iteration_bounds = array<i64: 1, 1, 1>, scalar_prefetch = 0 : i64, scratch_operands = 1 : i64, tpu.core_type = #tpu.core_type<tc>, window_params = [{transform_indices = @transform_0, window_bounds = array<i64: 16, 128>}, {transform_indices = @transform_1, window_bounds = array<i64: 128, 128>}, {transform_indices = @transform_2, window_bounds = array<i64: 16, 128>}, {transform_indices = @transform_3, window_bounds = array<i64: 1, 2, 128>}]} {
    %c0_i32 = arith.constant 0 : i32
    %0 = arith.cmpi eq, %arg2, %c0_i32 : i32
    %1 = arith.extui %0 : i1 to i32
    %c0_i32_0 = arith.constant 0 : i32
    %2 = arith.cmpi ne, %1, %c0_i32_0 : i32
    scf.if %2 {
      %cst_10 = arith.constant 0.000000e+00 : f32
      %12 = vector.broadcast %cst_10 : f32 to vector<16x128xf32>
      %c0_11 = arith.constant 0 : index
      %c0_12 = arith.constant 0 : index
      %13 = vector.load %arg7[%c0_11, %c0_12] : memref<16x128xf32, #tpu.memory_space<vmem>>, vector<16x128xf32>
      tpu.vector_store %arg7[%c0_11, %c0_12], %12 {strides = array<i32>} : memref<16x128xf32, #tpu.memory_space<vmem>>, vector<16x128xf32>,
    } else {
    }
    %c0 = arith.constant 0 : index
    %c0_1 = arith.constant 0 : index
    %3 = vector.load %arg7[%c0, %c0_1] : memref<16x128xf32, #tpu.memory_space<vmem>>, vector<16x128xf32>
    %c0_2 = arith.constant 0 : index
    %c0_3 = arith.constant 0 : index
    %4 = vector.load %arg3[%c0_2, %c0_3] : memref<16x128xbf16, #tpu.memory_space<vmem>>, vector<16x128xbf16>
    %c0_4 = arith.constant 0 : index
    %c0_5 = arith.constant 0 : index
    %5 = vector.load %arg4[%c0_4, %c0_5] : memref<128x128xbf16, #tpu.memory_space<vmem>>, vector<128x128xbf16>
    %cst = arith.constant dense<0.000000e+00> : vector<16x128xf32>
    %6 = tpu.matmul %4, %5, %cst {dimension_numbers = #tpu.dot_dimension_numbers<[1], [0], [0], [1], [0, 0, 1, 1], [], []>} : vector<16x128xbf16>, vector<128x128xbf16>, vector<16x128xf32> -> vector<16x128xf32>
    %7 = arith.addf %3, %6 : vector<16x128xf32>
    %c0_6 = arith.constant 0 : index
    %c0_7 = arith.constant 0 : index
    %8 = vector.load %arg7[%c0_6, %c0_7] : memref<16x128xf32, #tpu.memory_space<vmem>>, vector<16x128xf32>
    tpu.vector_store %arg7[%c0_6, %c0_7], %7 {strides = array<i32>} : memref<16x128xf32, #tpu.memory_space<vmem>>, vector<16x128xf32>,
    %c0_i32_8 = arith.constant 0 : i32
    %9 = arith.cmpi eq, %arg2, %c0_i32_8 : i32
    %10 = arith.extui %9 : i1 to i32
    %c0_i32_9 = arith.constant 0 : i32
    %11 = arith.cmpi ne, %10, %c0_i32_9 : i32
    scf.if %11 {
      %c0_10 = arith.constant 0 : index
      %c0_11 = arith.constant 0 : index
      %12 = vector.load %arg7[%c0_10, %c0_11] : memref<16x128xf32, #tpu.memory_space<vmem>>, vector<16x128xf32>
      %13 = arith.truncf %12 : vector<16x128xf32> to vector<16x128xbf16>
      %c0_12 = arith.constant 0 : index
      %c0_13 = arith.constant 0 : index
      %14 = vector.load %arg5[%c0_12, %c0_13] : memref<16x128xbf16, #tpu.memory_space<vmem>>, vector<16x128xbf16>
      tpu.vector_store %arg5[%c0_12, %c0_13], %13 {strides = array<i32>} : memref<16x128xbf16, #tpu.memory_space<vmem>>, vector<16x128xbf16>,
      %cst_14 = arith.constant dense<0.000000e+00> : vector<128xf32>
      %15 = vector.multi_reduction <add>, %12, %cst_14 [0] : vector<16x128xf32> to vector<128xf32>
      %16 = vector.shape_cast %15 : vector<128xf32> to vector<1x128xf32>
      %17 = vector.shape_cast %16 : vector<1x128xf32> to vector<1x1x128xf32>
      %c0_15 = arith.constant 0 : index
      %c0_16 = arith.constant 0 : index
      %c0_17 = arith.constant 0 : index
      %18 = vector.load %arg6[%c0_15, %c0_16, %c0_17] : memref<1x2x128xf32, #tpu.memory_space<vmem>>, vector<1x1x128xf32>
      tpu.vector_store %arg6[%c0_15, %c0_16, %c0_17], %17 {strides = array<i32>} : memref<1x2x128xf32, #tpu.memory_space<vmem>>, vector<1x1x128xf32>,
      %19 = arith.mulf %12, %12 : vector<16x128xf32>
      %cst_18 = arith.constant dense<0.000000e+00> : vector<128xf32>
      %20 = vector.multi_reduction <add>, %19, %cst_18 [0] : vector<16x128xf32> to vector<128xf32>
      %21 = vector.shape_cast %20 : vector<128xf32> to vector<1x128xf32>
      %22 = vector.shape_cast %21 : vector<1x128xf32> to vector<1x1x128xf32>
      %c0_19 = arith.constant 0 : index
      %c1 = arith.constant 1 : index
      %c0_20 = arith.constant 0 : index
      %23 = vector.load %arg6[%c0_19, %c1, %c0_20] : memref<1x2x128xf32, #tpu.memory_space<vmem>>, vector<1x1x128xf32>
      tpu.vector_store %arg6[%c0_19, %c1, %c0_20], %22 {strides = array<i32>} : memref<1x2x128xf32, #tpu.memory_space<vmem>>, vector<1x1x128xf32>,
    } else {
    }
    return
  }
  func.func @transform_0(%arg0: i32, %arg1: i32, %arg2: i32) -> (i32, i32) {
    %c0_i32 = arith.constant 0 : i32
    return %arg1, %arg2 : i32, i32
  }
  func.func @transform_1(%arg0: i32, %arg1: i32, %arg2: i32) -> (i32, i32) {
    %c0_i32 = arith.constant 0 : i32
    return %arg2, %arg0 : i32, i32
  }
  func.func @transform_2(%arg0: i32, %arg1: i32, %arg2: i32) -> (i32, i32) {
    %c0_i32 = arith.constant 0 : i32
    return %arg1, %arg0 : i32, i32
  }
  func.func @transform_3(%arg0: i32, %arg1: i32, %arg2: i32) -> (i32, i32, i32) {
    %c0_i32 = arith.constant 0 : i32
    %c0_i32_0 = arith.constant 0 : i32
    return %arg1, %c0_i32, %arg0 : i32, i32, i32
  }
}

module attributes {stable_mosaic.version = 11 : i64} {
  func.func @_bn_relu_res_kernel(%arg0: i32, %arg1: i32, %arg2: memref<16x128xbf16, #tpu.memory_space<vmem>>, %arg3: memref<1x128xf32, #tpu.memory_space<vmem>>, %arg4: memref<1x128xf32, #tpu.memory_space<vmem>>, %arg5: memref<16x128xf32, #tpu.memory_space<vmem>>, %arg6: memref<16x128xf32, #tpu.memory_space<vmem>>) attributes {dimension_semantics = [#tpu.dimension_semantics<parallel>, #tpu.dimension_semantics<parallel>], iteration_bounds = array<i64: 1, 1>, scalar_prefetch = 0 : i64, scratch_operands = 0 : i64, tpu.core_type = #tpu.core_type<tc>, window_params = [{transform_indices = @transform_0, window_bounds = array<i64: 16, 128>}, {transform_indices = @transform_1, window_bounds = array<i64: 1, 128>}, {transform_indices = @transform_2, window_bounds = array<i64: 1, 128>}, {transform_indices = @transform_3, window_bounds = array<i64: 16, 128>}, {transform_indices = @transform_4, window_bounds = array<i64: 16, 128>}]} {
    %c0 = arith.constant 0 : index
    %c0_0 = arith.constant 0 : index
    %0 = vector.load %arg2[%c0, %c0_0] : memref<16x128xbf16, #tpu.memory_space<vmem>>, vector<16x128xbf16>
    %1 = arith.extf %0 : vector<16x128xbf16> to vector<16x128xf32>
    %c0_1 = arith.constant 0 : index
    %c0_2 = arith.constant 0 : index
    %2 = vector.load %arg3[%c0_1, %c0_2] : memref<1x128xf32, #tpu.memory_space<vmem>>, vector<1x128xf32>
    %3 = vector.broadcast %2 : vector<1x128xf32> to vector<16x128xf32>
    %4 = arith.mulf %1, %3 : vector<16x128xf32>
    %c0_3 = arith.constant 0 : index
    %c0_4 = arith.constant 0 : index
    %5 = vector.load %arg4[%c0_3, %c0_4] : memref<1x128xf32, #tpu.memory_space<vmem>>, vector<1x128xf32>
    %6 = vector.broadcast %5 : vector<1x128xf32> to vector<16x128xf32>
    %7 = arith.addf %4, %6 : vector<16x128xf32>
    %cst = arith.constant 0.000000e+00 : f32
    %8 = vector.broadcast %cst : f32 to vector<16x128xf32>
    %9 = arith.maximumf %7, %8 : vector<16x128xf32>
    %c0_5 = arith.constant 0 : index
    %c0_6 = arith.constant 0 : index
    %10 = vector.load %arg5[%c0_5, %c0_6] : memref<16x128xf32, #tpu.memory_space<vmem>>, vector<16x128xf32>
    %11 = arith.addf %9, %10 : vector<16x128xf32>
    %c0_7 = arith.constant 0 : index
    %c0_8 = arith.constant 0 : index
    %12 = vector.load %arg6[%c0_7, %c0_8] : memref<16x128xf32, #tpu.memory_space<vmem>>, vector<16x128xf32>
    tpu.vector_store %arg6[%c0_7, %c0_8], %11 {strides = array<i32>} : memref<16x128xf32, #tpu.memory_space<vmem>>, vector<16x128xf32>,
    return
  }
  func.func @transform_0(%arg0: i32, %arg1: i32) -> (i32, i32) {
    %c0_i32 = arith.constant 0 : i32
    return %arg0, %arg1 : i32, i32
  }
  func.func @transform_1(%arg0: i32, %arg1: i32) -> (i32, i32) {
    %c0_i32 = arith.constant 0 : i32
    %c0_i32_0 = arith.constant 0 : i32
    return %c0_i32, %arg1 : i32, i32
  }
  func.func @transform_2(%arg0: i32, %arg1: i32) -> (i32, i32) {
    %c0_i32 = arith.constant 0 : i32
    %c0_i32_0 = arith.constant 0 : i32
    return %c0_i32, %arg1 : i32, i32
  }
  func.func @transform_3(%arg0: i32, %arg1: i32) -> (i32, i32) {
    %c0_i32 = arith.constant 0 : i32
    return %arg0, %arg1 : i32, i32
  }
  func.func @transform_4(%arg0: i32, %arg1: i32) -> (i32, i32) {
    %c0_i32 = arith.constant 0 : i32
    return %arg0, %arg1 : i32, i32
  }
}

</mosaic_0001>

<bundles_post_ra>
// kernel: fc_layer_forward.3
= control target key start
LH: loop header
LB: loop body
LE: loop exit
PB: predicated region body
PF: predicated region fallthrough
CT: control target
= control target key end

     0   :  { %s103_s0 = inlined_call_operand.vmem [shape: bf16[16,128], index: 0, kind: input, shape index: {}]   ;;  %s104_s1 = inlined_call_operand.vmem [shape: f32[1,128], index: 1, kind: input, shape index: {}]   ;;  %s105_s2 = inlined_call_operand.vmem [shape: f32[1,128], index: 2, kind: input, shape index: {}]   ;;  %s106_s3 = inlined_call_operand.vmem [shape: f32[16,128], index: 3, kind: input, shape index: {}]   ;;  %s107_s4 = inlined_call_operand.vmem [shape: f32[16,128], index: 4, kind: output, shape index: {}]  }
   0x1   :  { %v54_v0 = vld [vmem:[%s103_s0] sm:$0xff]   ;;  %v42_v10 = vld [vmem:[%s106_s3 + $0x8] sm:$0xff] }
   0x2   :  { %v51_v1 = vld [vmem:[%s104_s1] ss:$0 sm:$0xff]  ;;  %v55_v2 = vunpack.c.l.bf16 %v54_v0  ;;  %v56_v3 = vunpack.c.h.bf16 %v54_v0 }
   0x3   :  { %v52_v4 = vld [vmem:[%s105_s2] ss:$0 sm:$0xff] }
   0x4   :  { %v28_v5 = vmul.f32 %v55_v2, %v51_v1  ;;  %v29_v6 = vmul.f32 %v56_v3, %v51_v1  ;;  %v41_v9 = vld [vmem:[%s106_s3] sm:$0xff] }
   0x6   :  { %v37_v7 = vadd.f32 %v52_v4, %v28_v5  ;;  %v38_v8 = vadd.f32 %v52_v4, %v29_v6 }
   0x8   :  { %v39_v11 = vmax.f32 %v37_v7, 0.0  ;;  %v40_v12 = vmax.f32 %v38_v8, 0.0 }
   0xa   :  { %v43_v13 = vadd.f32 %v41_v9, %v39_v11  ;;  %v44_v14 = vadd.f32 %v42_v10, %v40_v12 }
   0xc   :  { %45 = vst [vmem:[%s107_s4] sm:$0xff] %v43_v13  ;;  %46 = vst [vmem:[%s107_s4 + $0x8] sm:$0xff] %v44_v14 }

// kernel: fc_layer_forward.2
= control target key start
LH: loop header
LB: loop body
LE: loop exit
PB: predicated region body
PF: predicated region fallthrough
CT: control target
= control target key end

     0   :  { %v238_v0 = vmov 0.0   ;;  %vm239_vm0 = vmmov 0   ;;  %s296_s1 = inlined_call_operand.vmem [shape: bf16[128,128], index: 1, kind: input, shape index: {}]   ;;  %s297_s0 = inlined_call_operand.vmem [shape: bf16[16,128], index: 0, kind: input, shape index: {}]   ;;  %s298_s2 = inlined_call_operand.vmem [shape: bf16[16,128], index: 2, kind: output, shape index: {0}]   ;;  %s299_s3 = inlined_call_operand.vmem [shape: f32[1,2,128], index: 3, kind: output, shape index: {1}]  }
   0x1   :  { %207 = vmatprep.subr.bf16.mxu0 %v238_v0  ;;  %v229_v1 = vld [vmem:[%s296_s1 + $0x38] sm:$0xff]   ;;  %223 = vmatprep.mubr.msk.bf16.mxu0 %vm239_vm0, %v238_v0  ;;  %v230_v2 = vld [vmem:[%s296_s1 + $0x30] sm:$0xff]   ;;  %v231_v3 = vld [vmem:[%s296_s1 + $0x28] sm:$0xff]  }
   0x2   :  { %208 = vmatpush3.bf16.msra.mxu0 %v229_v1  ;;  %v232_v4 = vld [vmem:[%s296_s1 + $0x20] sm:$0xff]   ;;  %v233_v5 = vld [vmem:[%s296_s1 + $0x18] sm:$0xff]   ;;  %v234_v6 = vld [vmem:[%s296_s1 + $0x10] sm:$0xff]  }
   0x3   :  { %209 = vmatprep.subr.bf16.mxu0 %v238_v0  ;;  %v235_v7 = vld [vmem:[%s296_s1 + $0x8] sm:$0xff]   ;;  %v236_v8 = vld [vmem:[%s296_s1] sm:$0xff]  }
   0x4   :  { %v237_v9 = vld [vmem:[%s297_s0] sm:$0xff]  }
   0x6   :  { %210 = vmatpush3.bf16.msra.mxu0 %v230_v2 }
   0x7   :  { %211 = vmatprep.subr.bf16.mxu0 %v238_v0 }
   0xa   :  { %212 = vmatpush3.bf16.msra.mxu0 %v231_v3 }
   0xb   :  { %213 = vmatprep.subr.bf16.mxu0 %v238_v0 }
   0xe   :  { %214 = vmatpush3.bf16.msra.mxu0 %v232_v4 }
   0xf   :  { %215 = vmatprep.subr.bf16.mxu0 %v238_v0 }
  0x12   :  { %216 = vmatpush3.bf16.msra.mxu0 %v233_v5 }
  0x13   :  { %217 = vmatprep.subr.bf16.mxu0 %v238_v0 }
  0x16   :  { %218 = vmatpush3.bf16.msra.mxu0 %v234_v6 }
  0x17   :  { %219 = vmatprep.subr.bf16.mxu0 %v238_v0 }
  0x1a   :  { %220 = vmatpush3.bf16.msra.mxu0 %v235_v7 }
  0x1b   :  { %221 = vmatprep.subr.bf16.mxu0 %v238_v0 }
  0x1e   :  { %222 = vmatpush3.bf16.msra.mxu0 %v236_v8 }
  0x21   :  { %224 = vmatmul.mubr.bf16.vlgmr.msra.gmra.mxu0 %v237_v9 }
  0xe1   :  { %v128_v10 = vpop.f32.mrf.mxu0 }
  0xe2   :  { %v162_v13 = vmul.f32 %v128_v10, %v128_v10 }
  0xe3   :  { %v225_v11 = vpop.f32.mrf.mxu0 }
  0xe5   :  { %v131_v12 = vpop.f32.mrf.mxu0 }
  0xe6   :  { %v196_v14 = vpack.c.bf16 %v131_v12, %v128_v10  ;;  %v154_v15 = vadd.f32 %v131_v12, %v128_v10  ;;  %v163_v16 = vmul.f32 %v131_v12, %v131_v12 }
  0xe7   :  { %v226_v17 = vpop.f32.mrf.mxu0 }
  0xe8   :  { %197 = vst [vmem:[%s298_s2] sm:$0xff] %v196_v14   ;;  %v155_v18 = vrot.slane %v154_v15, 4  ;;  %v164_v19 = vadd.f32 %v163_v16, %v162_v13 }
  0xea   :  { %v156_v20 = vadd.f32 %v155_v18, %v154_v15  ;;  %v165_v21 = vrot.slane %v164_v19, 4 }
  0xec   :  { %v157_v22 = vrot.slane %v156_v20, 2  ;;  %v166_v23 = vadd.f32 %v165_v21, %v164_v19 }
  0xee   :  { %v158_v24 = vadd.f32 %v157_v22, %v156_v20  ;;  %v167_v25 = vrot.slane %v166_v23, 2 }
  0xf0   :  { %v159_v26 = vrot.slane %v158_v24, 1  ;;  %v168_v27 = vadd.f32 %v167_v25, %v166_v23 }
  0xf2   :  { %v160_v28 = vadd.f32 %v159_v26, %v158_v24  ;;  %v169_v29 = vrot.slane %v168_v27, 1 }
  0xf4   :  { %161 = vst [vmem:[%s299_s3] sm:$0x1] %v160_v28  ;;  %v170_v30 = vadd.f32 %v169_v29, %v168_v27 }
  0xf6   :  { %171 = vst [vmem:[%s299_s3 + $0x1] sm:$0x1] %v170_v30 }

</bundles_post_ra>
